<compile_context>
chip_gen: v5e
topology: v5e:2x2
jax: 0.10.0
libtpu: 0.0.40
codegen_flags: <defaults>
</compile_context>

<pallas_src>
import functools

import jax
import jax.numpy as jnp
from jax import lax
from jax.experimental import pallas as pl
from jax.experimental.pallas import tpu as pltpu

_LANE = 128


def _style_loss_kernel(x_ref, tgt_hbm, g_ref, loss_ref, *, n, scale, mse_denom):
    # x_ref   : (N, tc)  feature chunk (lane axis = C), bf16 or f32
    # tgt_hbm : (N, N)   weight-scaled target gram, left in HBM (pl.ANY)
    # g_ref   : (N, N)   f32 output gram; resident accumulator across the grid
    # loss_ref: (1, 1)   f32 MSE loss, written once at the final step
    k = pl.program_id(0)

    @pl.when(k == 0)
    def _init():
        g_ref[...] = jnp.zeros_like(g_ref)

    x = x_ref[...]
    # Partial Gram: contract the lane (C) axis of BOTH operands on the MXU —
    # no transposed copy of x (no per-step XLU transpose).
    g_ref[...] += lax.dot_general(
        x, x,
        dimension_numbers=(((1,), (1,)), ((), ())),
        preferred_element_type=jnp.float32,
    )

    @pl.when(k == pl.num_programs(0) - 1)
    def _finalize():
        def _epilogue(tgt_vmem):
            # Target is needed only here: one DMA, one (non-pipelined) buffer.
            pltpu.sync_copy(tgt_hbm, tgt_vmem)
            g = g_ref[...] * scale          # weight / (a*b*c), applied once
            g_ref[...] = g
            diff = g - tgt_vmem[...]
            loss_ref[...] = jnp.sum(diff * diff, keepdims=True) / mse_denom

        pl.run_scoped(_epilogue, pltpu.VMEM((n, n), jnp.float32))


def _choose_c_tiling(c, tc=None):
    """Pick the contraction tile tc and (possibly zero-padded) channel count.

    Returns (tc, c_pad) with c_pad >= c, tc | c_pad, and tc lane-aligned
    (or tc == c_pad for tiny / ragged C). Zero-padding C is exact: zero
    columns contribute nothing to feats @ feats.T.
    """
    if tc is not None and c % tc == 0 and (tc == c or tc % _LANE == 0):
        return tc, c
    if c <= 2048 and c % _LANE != 0:
        return c, c  # single full-C block (always legal)
    c_pad = -(-c // _LANE) * _LANE
    best = _LANE
    for cand in range(_LANE, min(c_pad, 2048) + 1, _LANE):
        if c_pad % cand == 0:
            best = cand
    if best < 512 and c_pad > 512:
        # No decent divisor (e.g. C = 128 * prime): pad C up to a multiple of
        # 1024 so the X stream keeps large, pipelined tiles.
        c_pad = -(-c_pad // 1024) * 1024
        best = 1024
    return best, c_pad


def _vmem_limit_bytes(requested):
    """Per-generation VMEM cap: device capacity minus headroom (v7x = 64 MiB)."""
    cap = 64 << 20  # conservative default (v7x per-TensorCore VMEM)
    try:
        cap = int(getattr(pltpu.get_tpu_info(), "vmem_capacity_bytes", cap))
    except Exception:
        pass
    headroom = 8 << 20
    return int(max(1 << 20, min(requested, cap - headroom)))


def style_loss_forward(x, target, weight, *, tc=None, feat_dtype=jnp.bfloat16):
    """x: (a, b, c) float32; target: (a*b, a*b) float32 (= target_gram * weight).

    Returns (output, G, loss): output is the (unmodified) input,
    G = gram(x) * weight, loss = MSE(G, target).
    """
    a, b, c = x.shape
    n = a * b
    tc, c_pad = _choose_c_tiling(c, tc)
    num_k = c_pad // tc

    # Stream features in bf16 (default); MXU accumulation stays f32.
    feats = x.reshape(n, c).astype(feat_dtype)
    if c_pad != c:
        feats = jnp.pad(feats, ((0, 0), (0, c_pad - c)))
    target = target.astype(jnp.float32)

    kernel = functools.partial(
        _style_loss_kernel,
        n=n,
        scale=float(weight) / float(a * b * c),
        mse_denom=float(n * n),
    )

    # VMEM budget: double-buffered X tile + double-buffered G output block +
    # single-buffered target staging + slack; capped per generation.
    feat_bytes = jnp.dtype(feat_dtype).itemsize
    estimate = 2 * n * tc * feat_bytes + 2 * n * n * 4 + n * n * 4 + (1 << 20)
    vmem_limit = _vmem_limit_bytes(max(2 * estimate, 16 << 20))

    g, loss = pl.pallas_call(
        kernel,
        out_shape=(
            jax.ShapeDtypeStruct((n, n), jnp.float32),   # G = gram(x) * weight
            jax.ShapeDtypeStruct((1, 1), jnp.float32),   # MSE(G, target)
        ),
        grid=(num_k,),
        in_specs=[
            pl.BlockSpec((n, tc), lambda k: (0, k)),     # X chunk along C
            pl.BlockSpec(memory_space=pl.ANY),           # target stays in HBM
        ],
        out_specs=(
            pl.BlockSpec((n, n), lambda k: (0, 0)),      # resident accumulator
            pl.BlockSpec((1, 1), lambda k: (0, 0)),
        ),
        compiler_params=pltpu.CompilerParams(
            dimension_semantics=("arbitrary",),
            vmem_limit_bytes=vmem_limit,
        ),
    )(feats, target)

    # TODO(synk): for very large N (>= ~1792, where the resident N^2 working
    # set exceeds v7x's 64 MiB VMEM) tile the Gram output over (N/tm, N/tn, K)
    # and add a "parallel" row axis to use both v7x TensorCores; not needed
    # for typical style-loss channel counts.

    # `output = input.clone()` in the module just forwards the input; return
    # it directly instead of copying it through the kernel.
    return x, g, loss[0, 0]


def _reference(x, target, weight, feat_dtype=jnp.float32):
    a, b, c = x.shape
    feats = x.reshape(a * b, c).astype(feat_dtype)
    g = lax.dot_general(feats, feats, (((1,), (1,)), ((), ())),
                        preferred_element_type=jnp.float32)
    g = g / (a * b * c) * weight
    loss = jnp.mean((g - target) ** 2)
    return x, g, loss


if __name__ == "__main__":
    key = jax.random.PRNGKey(0)
    k_in, k_style = jax.random.split(key)

    # Small shapes consistent with the module's 3-D (a, b, c) input.
    a, b, c = 2, 4, 512
    n = a * b
    weight = 1000.0

    x = jax.random.normal(k_in, (a, b, c), dtype=jnp.float32)

    # Deterministic "style" target: gram matrix of a random style feature map,
    # pre-scaled by weight (matches `self.target = target.detach() * weight`).
    style = jax.random.normal(k_style, (a, b, c), dtype=jnp.float32)
    style_feats = style.reshape(n, c)
    target = (style_feats @ style_feats.T) / (a * b * c) * weight

    # 1) Default bf16 feature path; tc=128 -> 4 gridded accumulation steps.
    out, G, loss = style_loss_forward(x, target, weight, tc=128)
    jax.block_until_ready((out, G, loss))
    r_out, r_G, r_loss = _reference(x, target, weight, feat_dtype=jnp.bfloat16)
    assert jnp.allclose(out, r_out)
    assert jnp.allclose(G, r_G, atol=1e-3, rtol=1e-3)
    assert jnp.allclose(loss, r_loss, atol=1e-2, rtol=1e-3)

    # 2) f32 feature path (single full-C block) vs. the exact f32 reference.
    out32, G32, loss32 = style_loss_forward(x, target, weight,
                                            feat_dtype=jnp.float32)
    jax.block_until_ready((out32, G32, loss32))
    f_out, f_G, f_loss = _reference(x, target, weight, feat_dtype=jnp.float32)
    assert jnp.allclose(G32, f_G, atol=1e-4, rtol=1e-4)
    assert jnp.allclose(loss32, f_loss, atol=1e-3, rtol=1e-4)

    # bf16 quantization sanity check against the full-f32 loss.
    assert jnp.allclose(loss, f_loss, rtol=0.1)

    print("KERNEL_OK")
</pallas_src>

<mosaic_0001>
module attributes {stable_mosaic.version = 11 : i64} {
  func.func @_style_loss_kernel(%arg0: i32, %arg1: memref<8x128xbf16, #tpu.memory_space<vmem>>, %arg2: memref<8x8xf32, #tpu.memory_space<any>>, %arg3: memref<8x8xf32, #tpu.memory_space<vmem>>, %arg4: memref<1x1xf32, #tpu.memory_space<vmem>>) attributes {dimension_semantics = [#tpu.dimension_semantics<arbitrary>], iteration_bounds = array<i64: 4>, scalar_prefetch = 0 : i64, scratch_operands = 0 : i64, tpu.core_type = #tpu.core_type<tc>, window_params = [{transform_indices = @transform_0, window_bounds = array<i64: 8, 128>}, {}, {pipeline_mode = #tpu.pipeline_mode<synchronous>, transform_indices = @transform_2, window_bounds = array<i64: 8, 8>}, {pipeline_mode = #tpu.pipeline_mode<synchronous>, transform_indices = @transform_3, window_bounds = array<i64: 1, 1>}]} {
    %c0_i32 = arith.constant 0 : i32
    %0 = arith.cmpi eq, %arg0, %c0_i32 : i32
    %1 = arith.extui %0 : i1 to i32
    %c0_i32_0 = arith.constant 0 : i32
    %2 = arith.cmpi ne, %1, %c0_i32_0 : i32
    scf.if %2 {
      %cst_7 = arith.constant 0.000000e+00 : f32
      %11 = vector.broadcast %cst_7 : f32 to vector<8x8xf32>
      %c0_8 = arith.constant 0 : index
      %c0_9 = arith.constant 0 : index
      %12 = vector.load %arg3[%c0_8, %c0_9] : memref<8x8xf32, #tpu.memory_space<vmem>>, vector<8x8xf32>
      tpu.vector_store %arg3[%c0_8, %c0_9], %11 {strides = array<i32>} : memref<8x8xf32, #tpu.memory_space<vmem>>, vector<8x8xf32>,
    } else {
    }
    %c0 = arith.constant 0 : index
    %c0_1 = arith.constant 0 : index
    %3 = vector.load %arg1[%c0, %c0_1] : memref<8x128xbf16, #tpu.memory_space<vmem>>, vector<8x128xbf16>
    %c0_2 = arith.constant 0 : index
    %c0_3 = arith.constant 0 : index
    %4 = vector.load %arg3[%c0_2, %c0_3] : memref<8x8xf32, #tpu.memory_space<vmem>>, vector<8x8xf32>
    %cst = arith.constant dense<0.000000e+00> : vector<8x8xf32>
    %5 = tpu.matmul %3, %3, %cst {dimension_numbers = #tpu.dot_dimension_numbers<[1], [1], [0], [0], [0, 0, 1, 0], [], []>} : vector<8x128xbf16>, vector<8x128xbf16>, vector<8x8xf32> -> vector<8x8xf32>
    %6 = arith.addf %4, %5 : vector<8x8xf32>
    %c0_4 = arith.constant 0 : index
    %c0_5 = arith.constant 0 : index
    %7 = vector.load %arg3[%c0_4, %c0_5] : memref<8x8xf32, #tpu.memory_space<vmem>>, vector<8x8xf32>
    tpu.vector_store %arg3[%c0_4, %c0_5], %6 {strides = array<i32>} : memref<8x8xf32, #tpu.memory_space<vmem>>, vector<8x8xf32>,
    %c3_i32 = arith.constant 3 : i32
    %8 = arith.cmpi eq, %arg0, %c3_i32 : i32
    %9 = arith.extui %8 : i1 to i32
    %c0_i32_6 = arith.constant 0 : i32
    %10 = arith.cmpi ne, %9, %c0_i32_6 : i32
    scf.if %10 {
      "tpu.region"() ({
        %alloca = memref.alloca() : memref<8x8xf32, #tpu.memory_space<vmem>>
        "tpu.region"() ({
          %26 = tpu.sem_alloc : memref<!tpu.dma_semaphore, #tpu.memory_space<semaphore_mem>>
          tpu.enqueue_dma source(%arg2 : memref<8x8xf32, #tpu.memory_space<any>>) target(%alloca : memref<8x8xf32, #tpu.memory_space<vmem>>) target_semaphore(%26 : memref<!tpu.dma_semaphore, #tpu.memory_space<semaphore_mem>>)
          tpu.wait_dma2 semaphore(%26 : memref<!tpu.dma_semaphore, #tpu.memory_space<semaphore_mem>>) src(%arg2 : memref<8x8xf32, #tpu.memory_space<any>>) dst(%alloca : memref<8x8xf32, #tpu.memory_space<vmem>>)
          tpu.yield
        }) : () -> ()
        %c0_7 = arith.constant 0 : index
        %c0_8 = arith.constant 0 : index
        %11 = vector.load %arg3[%c0_7, %c0_8] : memref<8x8xf32, #tpu.memory_space<vmem>>, vector<8x8xf32>
        %cst_9 = arith.constant 0.244140625 : f32
        %12 = vector.broadcast %cst_9 : f32 to vector<8x8xf32>
        %13 = arith.mulf %11, %12 : vector<8x8xf32>
        %c0_10 = arith.constant 0 : index
        %c0_11 = arith.constant 0 : index
        %14 = vector.load %arg3[%c0_10, %c0_11] : memref<8x8xf32, #tpu.memory_space<vmem>>, vector<8x8xf32>
        tpu.vector_store %arg3[%c0_10, %c0_11], %13 {strides = array<i32>} : memref<8x8xf32, #tpu.memory_space<vmem>>, vector<8x8xf32>,
        %c0_12 = arith.constant 0 : index
        %c0_13 = arith.constant 0 : index
        %15 = vector.load %alloca[%c0_12, %c0_13] : memref<8x8xf32, #tpu.memory_space<vmem>>, vector<8x8xf32>
        %16 = arith.subf %13, %15 : vector<8x8xf32>
        %17 = arith.mulf %16, %16 : vector<8x8xf32>
        %18 = vector.shape_cast %17 : vector<8x8xf32> to vector<1x8x8xf32>
        %cst_14 = arith.constant dense<0.000000e+00> : vector<1xf32>
        %19 = vector.multi_reduction <add>, %18, %cst_14 [1, 2] : vector<1x8x8xf32> to vector<1xf32>
        %20 = vector.shape_cast %19 : vector<1xf32> to vector<1x1x1xf32>
        %21 = vector.extract %20[0, 0, 0] : f32 from vector<1x1x1xf32>
        %22 = vector.broadcast %21 : f32 to vector<1x1xf32>
        %cst_15 = arith.constant 6.400000e+01 : f32
        %23 = vector.broadcast %cst_15 : f32 to vector<1x1xf32>
        %24 = arith.divf %22, %23 : vector<1x1xf32>
        %c0_16 = arith.constant 0 : index
        %c0_17 = arith.constant 0 : index
        %25 = vector.load %arg4[%c0_16, %c0_17] : memref<1x1xf32, #tpu.memory_space<vmem>>, vector<1x1xf32>
        tpu.vector_store %arg4[%c0_16, %c0_17], %24 {strides = array<i32>} : memref<1x1xf32, #tpu.memory_space<vmem>>, vector<1x1xf32>,
        tpu.yield
      }) : () -> ()
    } else {
    }
    return
  }
  func.func @transform_0(%arg0: i32) -> (i32, i32) {
    %c0_i32 = arith.constant 0 : i32
    %c0_i32_0 = arith.constant 0 : i32
    return %c0_i32, %arg0 : i32, i32
  }
  func.func @transform_2(%arg0: i32) -> (i32, i32) {
    %c0_i32 = arith.constant 0 : i32
    %c0_i32_0 = arith.constant 0 : i32
    %c0_i32_1 = arith.constant 0 : i32
    return %c0_i32, %c0_i32_0 : i32, i32
  }
  func.func @transform_3(%arg0: i32) -> (i32, i32) {
    %c0_i32 = arith.constant 0 : i32
    %c0_i32_0 = arith.constant 0 : i32
    %c0_i32_1 = arith.constant 0 : i32
    return %c0_i32, %c0_i32_0 : i32, i32
  }
}

</mosaic_0001>

<bundles_post_ra>
// kernel: tpu_custom_call.1
= control target key start
LH: loop header
LB: loop body
LE: loop exit
PB: predicated region body
PF: predicated region fallthrough
CT: control target
= control target key end

     0   :  { %9 = vsyncpa [#allocation3], 0  ;;  %s676_s0 = inlined_call_operand.hbm [shape: bf16[8,512], index: 0, kind: input, shape index: {}]   ;;  %s677_s1 = inlined_call_operand.hbm [shape: f32[8,8], index: 1, kind: input, shape index: {}]   ;;  %s678_s2 = inlined_call_operand.hbm [shape: f32[8,8], index: 2, kind: output, shape index: {0}]   ;;  %s679_s3 = inlined_call_operand.hbm [shape: f32[1,1], index: 3, kind: output, shape index: {1}]  }
   0x1   :  { %11 = vsyncpa [#allocation3 + $0x1], 0 }
   0x2   :  { %12 = vsyncpa [#allocation4], 0 }
   0x3   :  { %13 = vsyncpa [#allocation7], 0  ;;  %s560_s12 = smov 0   ;;  %s562_s13 = smov 0  }
   0x4   :  { %s564_s14 = smov 0   ;;  %s566_s15 = smov 0  }
   0x5 LB: > { %s579_s16 = sadd.s32 4294967295, %s533_s15   ;;  %s582_s17 = sadd.s32 1, %s533_s15   ;;  %s533_s15 = sphi %s566_s15, %s686_s15   ;;  %s529_s14 = sphi %s564_s14, %s685_s14   ;;  %s525_s13 = sphi %s562_s13, %s684_s13   ;;  %s521_s12 = sphi %s560_s12, %s683_s12  }
   0x6   : > { %s23_s18 = ssub.s32 %s533_s15, %s582_s17  ;;  %s26_s19 = sadd.s32 1, %s529_s14 }
   0x7   : > { %p24_p0 = scmp.eq.s32.totalorder %s23_s18, 0  ;;  %p33_p1 = scmp.ne.s32.totalorder %s529_s14, %s525_s13 }
   0x8   : > { %p34_p2 = scmp.eq.s32.totalorder %s533_s15, 0  ;;  %p39_p3 = scmp.ne.s32.totalorder %s525_s13, %s521_s12 }
   0x9   : > { %s592_s20 = scalar_select %p24_p0, %s529_s14, %s26_s19  }
   0xa   : > { %p594_p4 = por %p34_p2, %p33_p1  ;;  %p40_p5 = scmp.eq.s32.totalorder %s579_s16, 0 }
   0xb   : > { %p335_p6 = scmp.lt.s32.totalorder %s533_s15, 4  ;;  %s105_s23 = sand.u32 1, %s529_s14  }
   0xc   : > { %p600_p7 = por %p40_p5, %p39_p3  ;;  %s307_s24 = sshll.u32 %s105_s23, 2 }
   0xd   : > { %s308_s25 = sshll.u32 %s533_s15, 2  ;;  %s109_s29 = scalar_lea.vmem [#allocation2], %s307_s24 }
   0xe   : > { %s113_s28 = scalar_lea.hbm %s676_s0, %s308_s25  ;;  %s117_s30 = sshll.u32 %s109_s29, 4  ;;  %s118_s30 = int_to_ptr.vmem [resolvable:$true] %s117_s30 }
   0xf   : > { %s115_s4 = sshll.u32 %s113_s28, 4  ;;  %p611_p8 = pnand %p335_p6, %p594_p4  ;;  %s116_s4 = int_to_ptr.hbm [resolvable:$true] %s115_s4 }
  0x10   : > { %p309_p9 = scmp.ge.s32.totalorder %s533_s15, 1  ;;  %p122_p10 = scmp.lt.s32.totalorder %s533_s15, 5 }
  0x11   : > { %s106_s6 = scalar_lea.sflag [#allocation3], %s105_s23  ;;  %s379_s7 = sshra.s32 %s116_s4, 4  ;;  %s380_s7 = int_to_ptr.hbm [resolvable:$true] %s379_s7 }
  0x12   : > { %s381_s8 = scalar_lea.hbm %s380_s7, 4  ;;  %p383_p12 = pneg %p611_p8 }
  0x13   : > { %p382_p11 = scmp.ne.s32.totalorder %s380_s7, %s381_s8  ;;  %s386_s11 = scalar_lea.hbm %s676_s0, 16 }
  0x14   : > { %p387_p1 = scmp.lt.s32.totalorder %s380_s7, %s676_s0  ;;  %p388_p2 = scmp.lt.s32.totalorder %s386_s11, %s381_s8 }
  0x15   : > { %p384_p13 = pnand %p383_p12, %p382_p11 }
  0x16   : > { %p389_p3 = por %p388_p2, %p387_p1 }
  0x17   : > { %p385_p0 = pneg %p384_p13 }
  0x19   : > { %p390_p4 = pnand %p389_p3, %p385_p0 }
  0x1b   : > { %393 = shalt.err (!%p390_p4)
}
  0x1c   : > { %334 = dma.hbm_to_vmem [thread:$0]  (!%p611_p8), %s116_s4, 64, %s118_s30, %s106_s6  }
  0x1d   : > { %p123_p5 = pnand %p309_p9, %p122_p10 }
  0x1e   : > { %s128_s19 = sand.u32 (!%p123_p5), 1, %s525_s13  }
  0x1f   : > { %126 = sbr.rel (%p123_p5) target bundleno = 392 (0x188), region = 24  ;;  %s310_s21 = sshll.u32 (!%p123_p5), %s128_s19, 2 }
  0x20   : > { %s129_s23 = scalar_lea.sflag (!%p123_p5), [#allocation3], %s128_s19  ;;  %s132_s24 = scalar_lea.vmem (!%p123_p5), [#allocation2], %s310_s21 }
  0x24   : > { %506 = dma.done.wait (%p600_p7), %s129_s23, 64  }
  0x25   : > { %508 = vsyncadd (%p600_p7), %s129_s23, 4294967232  ;;  %p311_p6 = scmp.ne.s32.totalorder %s579_s16, 0 }
  0x27   : > { %153 = sbr.rel (%p311_p6) target bundleno = 46 (0x2e), region = 32 }
  0x2c   : > { %vm154_vm0 = vcmask 64512   ;;  %v535_v0 = vmov 0.0  }
  0x2d   : > { %155 = vst.msk [vmem:[#allocation5] sm:$0xff] %vm154_vm0, %v535_v0 }
  0x2e PF: > { %v156_v1 = vld [vmem:[%s132_s24] sm:$0xf]  ;;  %vm172_vm1 = vcmask 64512   ;;  %p312_p8 = scmp.ne.s32.totalorder %s579_s16, 3 }
  0x2f   : > { %165 = vmatpush.bf16.xpose.msra.mxu0 %v156_v1 }
  0x34   : > { %v157_v2 = vld [vmem:[#allocation5] sm:$0xff] }
  0x36   : > { %166 = vmatmul.bf16.vlgmr.msra.gmra.mxu0 %v156_v1 }
  0xb3   : > { %v167_v3 = vpop.f32.mrf.mxu0 }
  0xb4   : > { %v171_v4 = vadd.f32 %v167_v3, %v157_v2 }
  0xb6   : > { %173 = vst.msk [vmem:[#allocation5] sm:$0xff] %vm172_vm1, %v171_v4 }
  0xb7   : > { %177 = sbr.rel (%p312_p8) target bundleno = 382 (0x17e), region = 36 }
  0xbb   : > { %v169_v5 = vpop.f32.mrf.mxu0 }
  0xbc   : > { %s185_s25 = sshll.u32 %s677_s1, 4  ;;  %s536_s26 = smov [#allocation8]   ;;  %s186_s25 = int_to_ptr.hbm [resolvable:$true] %s185_s25 }
  0xbd   : > { %s187_s27 = sshll.u32 %s536_s26, 4  ;;  %s188_s27 = int_to_ptr.vmem [resolvable:$true] %s187_s27 }
  0xbe   : > { %190 = dma.hbm_to_vmem [thread:$0]  %s186_s25, 128, %s188_s27, [#allocation9] }
  0xbf   : > { %509 = dma.done.wait [#allocation9], 128 }
  0xc0   : > { %510 = vsyncadd [#allocation9], 4294967168  ;;  %v194_v6 = vld [vmem:[#allocation5] sm:$0xff]  ;;  %v197_v7 = vld [vmem:[#allocation8] sm:$0xff]  ;;  %v537_v19 = vmov 64.0   ;;  %vm219_vm3 = vcmask 0  }
  0xc1   : > { %v195_v8 = vmul.f32 0.24414063, %v194_v6  ;;  %377 = vrcp.f32 %v537_v19 }
  0xc3   : > { %196 = vst.msk [vmem:[#allocation5] sm:$0xff] %vm172_vm1, %v195_v8  ;;  %v198_v9 = vsub.f32 %v195_v8, %v197_v7 }
  0xc5   : > { %v199_v10 = vmul.f32 %v198_v9, %v198_v9 }
  0xc7   : > { %v200_v11 = vsel %vm172_vm1, %v199_v10, 0.0  ;;  %v378_v20 = vpop.eup %377 }
  0xc8   : > { %201 = vadd.xlane.f32.xlu0 %v200_v11  ;;  %v212_v21 = vmul.f32 64.0, %v378_v20  ;;  %vm216_vm2 = vweird.f32 %v378_v20 }
  0xca   : > { %v213_v22 = vsub.f32 1.0, %v212_v21 }
  0xcc   : > { %v214_v23 = vmul.f32 %v378_v20, %v213_v22 }
  0xce   : > { %v215_v24 = vadd.f32 %v378_v20, %v214_v23 }
  0xd0   : > { %v217_v25 = vsel %vm216_vm2, %v378_v20, %v215_v24 }
 0x13b   : > { %v202_v12 = vpop.xlane.xlu0 %201 }
 0x13c   : > { %v203_v13 = vrot.slane %v202_v12, 4 }
 0x13e   : > { %v204_v14 = vadd.f32 %v203_v13, %v202_v12 }
 0x140   : > { %v205_v15 = vrot.slane %v204_v14, 2 }
 0x142   : > { %v206_v16 = vadd.f32 %v205_v15, %v204_v14 }
 0x144   : > { %v207_v17 = vrot.slane %v206_v16, 1 }
 0x146   : > { %v208_v18 = vadd.f32 %v207_v17, %v206_v16 }
 0x148   : > { %319 = vpush %v208_v18 }
 0x179   : > { %s320_s28 = spop %319 }
 0x17a   : > { %v210_v26 = vstv %s320_s28 }
 0x17b   : > { %v218_v27 = vmul.f32 %v217_v25, %v210_v26 }
 0x17d   : > { %220 = vst.msk [vmem:[#allocation6] sm:$0x1] %vm219_vm3, %v218_v27 }
 0x17e PF: > { %p336_p7 = scmp.eq.s32.totalorder %s579_s16, 3  ;;  %s538_s29 = smov [#allocation5]  }
 0x17f   : > { %s227_s30 = sshll.u32 %s538_s29, 4  ;;  %s229_s6 = sshll.u32 %s678_s2, 4  ;;  %s228_s30 = int_to_ptr.vmem [resolvable:$true] %s227_s30  ;;  %s230_s6 = int_to_ptr.hbm [resolvable:$true] %s229_s6 }
 0x180   : > { %324 = dma.vmem_to_hbm [thread:$0]  (%p336_p7), %s228_s30, 128, %s230_s6, [#allocation4]  }
 0x181   : > { %s241_s9 = sshll.u32 %s679_s3, 4  ;;  %s539_s10 = smov [#allocation6]   ;;  %s242_s9 = int_to_ptr.hbm [resolvable:$true] %s241_s9 }
 0x182   : > { %s239_s11 = sshll.u32 %s539_s10, 4  ;;  %s240_s11 = int_to_ptr.vmem [resolvable:$true] %s239_s11 }
 0x183   : > { %326 = dma.vmem_to_hbm [thread:$0]  (%p336_p7), %s240_s11, 16, %s242_s9, [#allocation7]  }
 0x184   : > { %512 = dma.done.wait (%p336_p7), [#allocation4], 128  }
 0x185   : > { %514 = vsyncadd (%p336_p7), [#allocation4], 4294967168 }
 0x186   : > { %516 = dma.done.wait (%p336_p7), [#allocation7], 16  }
 0x187   : > { %518 = vsyncadd (%p336_p7), [#allocation7], 4294967280 }
 0x188 PF: > { %p16_p9 = scmp.ge.s32.totalorder %s582_s17, 6   ;;  %s683_s12 = smov %s525_s13 }
 0x189   : > { %s684_s13 = smov %s529_s14  ;;  %s685_s14 = smov %s592_s20 }
 0x18a   : > { %s686_s15 = smov %s582_s17  ;;  %18 = sbr.rel (!%p16_p9) target bundleno = 5 (0x5), region = 83 }
 0x18f   :  { %260 = vsyncpa [#allocation3], 1 }
 0x190   :  { %262 = vsyncpa [#allocation3 + $0x1], 1 }
 0x191   :  { %263 = vsyncpa [#allocation4], 1 }
 0x192   :  { %265 = vsyncpa [#allocation4 + $0x1], 1 }
 0x193   :  { %266 = vsyncpa [#allocation7], 1 }

</bundles_post_ra>
